<compile_context>
chip_gen: v5e
topology: v5e:2x2
jax: 0.10.0
libtpu: 0.0.40
codegen_flags: <defaults>
</compile_context>

<pallas_src>
import jax
import jax.numpy as jnp
from jax.experimental import pallas as pl
from jax.experimental.pallas import tpu as pltpu


# ---------------------------------------------------------------------------
# Kernel: elementwise sin on one (block_rows, _LANES) tile.
# ---------------------------------------------------------------------------
def _sin_kernel(x_ref, o_ref):
    o_ref[...] = jnp.sin(x_ref[...])


_LANES = 512            # lane-dense last dim (multiple of 128) -> unmasked vst
_MAX_BLOCK_ROWS = 2048  # up to 4 MiB f32/block; ~16 MiB with in+out dbl-buffering
_MIN_GRID_BLOCKS = 4    # keep >=4 grid steps for mid-size inputs (v7x 2 TCs +
                        # DMA/compute overlap); tiny inputs collapse gracefully


def _round_up(a, b):
    return (a + b - 1) // b * b


def _sublane(dtype):
    # Sub-32-bit dtypes pack along sublanes: 8 rows (f32), 16 (bf16/f16), 32 (i8/fp8).
    return max(8, 32 // jnp.dtype(dtype).itemsize)


@jax.jit
def sin_act(x):
    """Elementwise sin via a tiled, lane-dense Pallas TPU kernel (shape/dtype preserving)."""
    orig_shape = x.shape
    dtype = x.dtype
    n = x.size
    if n == 0:
        return x

    sub = _sublane(dtype)

    # Lay out as a lane-dense (rows, _LANES) slab.
    flat = x.reshape(-1)
    rows = pl.cdiv(n, _LANES)
    n_pad = rows * _LANES
    padded = n_pad != n
    if padded:
        # Slow path only when the element count isn't lane-aligned.
        flat = jnp.pad(flat, (0, n_pad - n))
    x2d = flat.reshape(rows, _LANES)

    # Block rows: as large as possible (near-roofline tiles, amortized grid-step
    # overhead) but capped so mid-size inputs still produce >= _MIN_GRID_BLOCKS
    # grid steps for v7x's two TensorCores.  Always a multiple of the sublane
    # packing factor; the tail block (rows % block_rows) is masked by Pallas.
    block_rows = _round_up(max(pl.cdiv(rows, _MIN_GRID_BLOCKS), sub), sub)
    block_rows = min(block_rows, _MAX_BLOCK_ROWS)
    grid = (pl.cdiv(rows, block_rows),)

    itemsize = jnp.dtype(dtype).itemsize
    cost = pl.CostEstimate(
        flops=0,
        transcendentals=n_pad,             # advisory only (sin is a VPU polynomial)
        bytes_accessed=2 * n_pad * itemsize,
    )

    out2d = pl.pallas_call(
        _sin_kernel,
        out_shape=jax.ShapeDtypeStruct((rows, _LANES), dtype),
        grid=grid,
        in_specs=[pl.BlockSpec((block_rows, _LANES), lambda i: (i, 0))],
        out_specs=pl.BlockSpec((block_rows, _LANES), lambda i: (i, 0)),
        compiler_params=pltpu.CompilerParams(
            dimension_semantics=("parallel",),   # shard the row axis across v7x's 2 TCs
            vmem_limit_bytes=32 * 1024 * 1024,   # explicit; max tiles use ~16 MiB
        ),
        cost_estimate=cost,
    )(x2d)

    if padded:
        return out2d.reshape(-1)[:n].reshape(orig_shape)
    return out2d.reshape(orig_shape)


# ---------------------------------------------------------------------------
if __name__ == "__main__":
    key = jax.random.PRNGKey(0)

    # Primary check: lane-aligned input (fast path, no pad / no slice).
    B, C, H, W = 2, 4, 16, 16
    x = jax.random.normal(key, (B, C, H, W), jnp.float32)
    out = jax.block_until_ready(sin_act(x))
    assert out.shape == x.shape, out.shape
    assert out.dtype == x.dtype, out.dtype
    ref = jnp.sin(x)
    assert jnp.allclose(out, ref, atol=1e-6, rtol=1e-6), float(
        jnp.max(jnp.abs(out - ref))
    )

    # Secondary check: non-lane-aligned input exercises the pad/slice path.
    y = jax.random.normal(jax.random.PRNGKey(1), (3, 7, 11), jnp.float32)
    out_y = jax.block_until_ready(sin_act(y))
    assert out_y.shape == y.shape, out_y.shape
    assert jnp.allclose(out_y, jnp.sin(y), atol=1e-6, rtol=1e-6), float(
        jnp.max(jnp.abs(out_y - jnp.sin(y)))
    )

    print("KERNEL_OK")
</pallas_src>

<mosaic_0001>
module attributes {stable_mosaic.version = 11 : i64} {
  func.func @_sin_kernel(%arg0: i32, %arg1: memref<8x512xf32, #tpu.memory_space<vmem>>, %arg2: memref<8x512xf32, #tpu.memory_space<vmem>>) attributes {dimension_semantics = [#tpu.dimension_semantics<parallel>], iteration_bounds = array<i64: 1>, scalar_prefetch = 0 : i64, scratch_operands = 0 : i64, tpu.core_type = #tpu.core_type<tc>, window_params = [{transform_indices = @transform_0, window_bounds = array<i64: 8, 512>}, {transform_indices = @transform_1, window_bounds = array<i64: 8, 512>}]} {
    %c0 = arith.constant 0 : index
    %c0_0 = arith.constant 0 : index
    %0 = vector.load %arg1[%c0, %c0_0] : memref<8x512xf32, #tpu.memory_space<vmem>>, vector<8x512xf32>
    %1 = math.sin %0 : vector<8x512xf32>
    %c0_1 = arith.constant 0 : index
    %c0_2 = arith.constant 0 : index
    %2 = vector.load %arg2[%c0_1, %c0_2] : memref<8x512xf32, #tpu.memory_space<vmem>>, vector<8x512xf32>
    tpu.vector_store %arg2[%c0_1, %c0_2], %1 {strides = array<i32>} : memref<8x512xf32, #tpu.memory_space<vmem>>, vector<8x512xf32>,
    return
  }
  func.func @transform_0(%arg0: i32) -> (i32, i32) {
    %c0_i32 = arith.constant 0 : i32
    %c0_i32_0 = arith.constant 0 : i32
    return %arg0, %c0_i32 : i32, i32
  }
  func.func @transform_1(%arg0: i32) -> (i32, i32) {
    %c0_i32 = arith.constant 0 : i32
    %c0_i32_0 = arith.constant 0 : i32
    return %arg0, %c0_i32 : i32, i32
  }
}

</mosaic_0001>

<bundles_post_ra>
// kernel: sin_act.1
= control target key start
LH: loop header
LB: loop body
LE: loop exit
PB: predicated region body
PF: predicated region fallthrough
CT: control target
= control target key end

     0   :  { %v682_v22 = vmov 683565275   ;;  %v683_v24 = vmov 2475754826   ;;  %v684_v26 = vmov 2131351028   ;;  %s850_s0 = inlined_call_operand.vmem [shape: f32[4,512], index: 0, kind: input, shape index: {}]   ;;  %s851_s1 = inlined_call_operand.vmem [shape: f32[4,512], index: 1, kind: output, shape index: {}]  }
   0x1   :  { %v702_v0 = vld [vmem:[%s850_s0] sm:$0xff]  ;;  %v707_v1 = vld [vmem:[%s850_s0 + $0x8] sm:$0xff]  ;;  %v685_v28 = vmov 2102212464   ;;  %v686_v30 = vmov 920167782  }
   0x2   :  { %v12_v2 = vand.u32 2147483647, %v702_v0  ;;  %v15_v3 = vand.u32 2139095040, %v702_v0  ;;  %v167_v6 = vand.u32 2147483647, %v707_v1  ;;  %v170_v7 = vand.u32 2139095040, %v707_v1 }
   0x3   :  { %v687_v37 = vmov 1326507024  }
   0x4   :  { %v16_v4 = vshrl.u32 %v15_v3, 23  ;;  %v19_v5 = vand.u32 8388607, %v12_v2  ;;  %v171_v10 = vshrl.u32 %v170_v7, 23  ;;  %v174_v14 = vand.u32 8388607, %v167_v6 }
   0x6   :  { %v663_v8 = vadd.s32 4294967169, %v16_v4  ;;  %v20_v9 = vor.u32 8388608, %v19_v5  ;;  %v666_v13 = vadd.s32 4294967169, %v171_v10  ;;  %v175_v20 = vor.u32 8388608, %v174_v14 }
   0x8   :  { %v22_v11 = vadd.s32 1, %v663_v8  ;;  %v715_v12 = vshll.u32 %v20_v9, 8  ;;  %v177_v16 = vadd.s32 1, %v666_v13  ;;  %v736_v57 = vshll.u32 %v175_v20, 8 }
   0xa   :  { %vm23_vm0 = vcmp.gt.s32.totalorder %v22_v11, 0  ;;  %v61_v19 = vand.u32 65535, %v715_v12  ;;  %vm178_vm2 = vcmp.gt.s32.totalorder %v177_v16, 0  ;;  %v62_v56 = vshrl.u32 %v715_v12, 16 }
   0xb   :  { %v24_v15 = vsel %vm23_vm0, %v22_v11, 0  ;;  %v179_v42 = vsel %vm178_vm2, %v177_v16, 0 }
   0xc   :  { %v25_v17 = vshrl.u32 %v24_v15, 5  ;;  %v26_v18 = vand.u32 31, %v24_v15  ;;  %v727_v45 = vand.u32 31, %v179_v42  ;;  %v743_v61 = vshrl.u32 %v179_v42, 5 }
   0xe   :  { %v27_v21 = vsub.s32 32, %v26_v18  ;;  %v29_v23 = vshll.u32 %v682_v22, %v26_v18  ;;  %v32_v25 = vshll.u32 %v683_v24, %v26_v18  ;;  %v35_v27 = vshll.u32 %v684_v26, %v26_v18 }
   0xf   :  { %v38_v29 = vshll.u32 %v685_v28, %v26_v18  ;;  %v41_v31 = vshll.u32 %v686_v30, %v26_v18  ;;  %vm44_vm1 = vcmp.lt.s32.totalorder %v25_v17, 1  ;;  %vm45_vm3 = vcmp.lt.s32.totalorder %v25_v17, 2 }
  0x10   :  { %v28_v32 = vshrl.u32 %v682_v22, %v27_v21  ;;  %v30_v33 = vshrl.u32 %v683_v24, %v27_v21  ;;  %v33_v34 = vshrl.u32 %v684_v26, %v27_v21  ;;  %v36_v35 = vshrl.u32 %v685_v28, %v27_v21 }
  0x11   :  { %v39_v36 = vshrl.u32 %v686_v30, %v27_v21  ;;  %v42_v38 = vshrl.u32 %v687_v37, %v27_v21  ;;  %vm47_vm4 = vcmp.lt.s32.totalorder %v25_v17, 4  ;;  %vm46_vm5 = vcmp.lt.s32.totalorder %v25_v17, 3 }
  0x12   :  { %v31_v39 = vor.u32 %v30_v33, %v29_v23  ;;  %v34_v40 = vor.u32 %v33_v34, %v32_v25  ;;  %v37_v41 = vor.u32 %v36_v35, %v35_v27  ;;  %v733_v53 = vsub.s32 32, %v727_v45 }
  0x13   :  { %v40_v43 = vor.u32 %v39_v36, %v38_v29  ;;  %v43_v44 = vor.u32 %v42_v38, %v41_v31  ;;  %v184_v5 = vshll.u32 %v682_v22, %v727_v45  ;;  %v187_v8 = vshll.u32 %v683_v24, %v727_v45 }
  0x14   :  { %v48_v46 = vsel %vm44_vm1, %v28_v32, %v31_v39  ;;  %v49_v47 = vsel %vm47_vm4, %v37_v41, 2102212464  ;;  %v52_v48 = vsel %vm44_vm1, %v31_v39, %v34_v40  ;;  %v56_v49 = vsel %vm44_vm1, %v34_v40, %v37_v41 }
  0x15   :  { %v50_v50 = vsel %vm46_vm5, %v34_v40, %v49_v47  ;;  %v53_v51 = vsel %vm47_vm4, %v40_v43, 920167782  ;;  %v57_v52 = vsel %vm47_vm4, %v43_v44, 1326507024  ;;  %v185_v7 = vshrl.u32 %v683_v24, %v733_v53 }
  0x16   :  { %v54_v54 = vsel %vm46_vm5, %v37_v41, %v53_v51  ;;  %v58_v55 = vsel %vm46_vm5, %v40_v43, %v57_v52  ;;  %v739_v58 = vsel %vm45_vm3, %v48_v46, %v50_v50  ;;  %v188_v9 = vshrl.u32 %v684_v26, %v733_v53 }
  0x17   :  { %v55_v59 = vsel %vm45_vm3, %v52_v48, %v54_v54  ;;  %v59_v60 = vsel %vm45_vm3, %v56_v49, %v58_v55  ;;  %v190_v14 = vshll.u32 %v684_v26, %v727_v45  ;;  %v751_v34 = vor.u32 %v185_v7, %v184_v5 }
  0x18   :  { %v63_v62 = vand.u32 65535, %v59_v60  ;;  %v64_v63 = vshrl.u32 %v59_v60, 16  ;;  %v85_v3 = vand.u32 65535, %v55_v59  ;;  %v86_v4 = vshrl.u32 %v55_v59, 16 }
  0x19   :  { %v688_v35 = vmov 0   ;;  %v193_v40 = vshll.u32 %v685_v28, %v727_v45  ;;  %v189_v43 = vor.u32 %v188_v9, %v187_v8  ;;  %v194_v48 = vshrl.u32 %v686_v30, %v733_v53 }
  0x1a   :  { %v65_v10 = vmul.u32 %v63_v62, %v61_v19  ;;  %v66_v11 = vmul.u32 %v64_v63, %v61_v19  ;;  %v67_v13 = vmul.u32 %v63_v62, %v62_v56  ;;  %v68_v15 = vmul.u32 %v64_v63, %v62_v56 }
  0x1b   :  { %v87_v16 = vmul.u32 %v85_v3, %v61_v19  ;;  %v88_v17 = vmul.u32 %v86_v4, %v61_v19  ;;  %v89_v18 = vmul.u32 %v85_v3, %v62_v56  ;;  %v90_v25 = vmul.u32 %v86_v4, %v62_v56 }
  0x1c   :  { %v69_v20 = vshll.u32 %v66_v11, 16  ;;  %v70_v21 = vshrl.u32 %v66_v11, 16  ;;  %v71_v23 = vshll.u32 %v67_v13, 16  ;;  %v72_v27 = vshrl.u32 %v67_v13, 16 }
  0x1d   :  { %v91_v29 = vshll.u32 %v88_v17, 16  ;;  %v92_v31 = vshrl.u32 %v88_v17, 16  ;;  %v93_v32 = vshll.u32 %v89_v18, 16  ;;  %v94_v33 = vshrl.u32 %v89_v18, 16 }
  0x1e   :  { %vm73_vm6 = vc.u32 %v65_v10, %v69_v20  ;;  %v75_v24 = vadd.s32 %v69_v20, %v65_v10  ;;  %v191_v19 = vshrl.u32 %v685_v28, %v733_v53  ;;  %v196_v50 = vshll.u32 %v686_v30, %v727_v45 }
  0x1f   :  { %v74_v26 = vsel %vm73_vm6, 1, %v688_v35  ;;  %vm95_vm7 = vc.u32 %v87_v16, %v91_v29  ;;  %v97_v36 = vadd.s32 %v91_v29, %v87_v16  ;;  %v197_v51 = vshrl.u32 %v687_v37, %v733_v53 }
  0x20   :  { %v76_v38 = vadd.s32 %v74_v26, %v68_v15  ;;  %vm77_vm8 = vc.u32 %v75_v24, %v71_v23  ;;  %v96_v39 = vsel %vm95_vm7, 1, %v688_v35  ;;  %v192_v47 = vor.u32 %v191_v19, %v190_v14 }
  0x21   :  { %v78_v41 = vsel %vm77_vm8, 1, %v688_v35  ;;  %v98_v42 = vadd.s32 %v96_v39, %v90_v25  ;;  %vm99_vm9 = vc.u32 %v97_v36, %v93_v32  ;;  %vm199_vm10 = vcmp.lt.s32.totalorder %v743_v61, 1 }
  0x22   :  { %v80_v44 = vadd.s32 %v78_v41, %v76_v38  ;;  %v100_v46 = vsel %vm99_vm9, 1, %v688_v35  ;;  %v768_v52 = vadd.s32 %v97_v36, %v93_v32  ;;  %v195_v54 = vor.u32 %v194_v48, %v193_v40 }
  0x23   :  { %v102_v49 = vadd.s32 %v100_v46, %v98_v42  ;;  %vm201_vm11 = vcmp.lt.s32.totalorder %v743_v61, 3  ;;  %v198_v56 = vor.u32 %v197_v51, %v196_v50  ;;  %vm200_vm12 = vcmp.lt.s32.totalorder %v743_v61, 2 }
  0x24   :  { %v81_v28 = vadd.s32 %v80_v44, %v70_v21  ;;  %vm202_vm13 = vcmp.lt.s32.totalorder %v743_v61, 4  ;;  %v207_v30 = vsel %vm199_vm10, %v751_v34, %v189_v43  ;;  %v216_v62 = vand.u32 65535, %v736_v57 }
  0x25   :  { %v103_v55 = vadd.s32 %v102_v49, %v92_v31  ;;  %v208_v37 = vsel %vm202_vm13, %v195_v54, 920167782  ;;  %v217_v63 = vshrl.u32 %v736_v57, 16  ;;  %v105_v3 = vmul.u32 %v715_v12, %v739_v58 }
  0x26   :  { %v773_v59 = vadd.s32 %v81_v28, %v72_v27  ;;  %v209_v60 = vsel %vm201_vm11, %v192_v47, %v208_v37  ;;  %v211_v5 = vsel %vm199_vm10, %v189_v43, %v192_v47  ;;  %v212_v8 = vsel %vm202_vm13, %v198_v56, 1326507024 }
  0x27   :  { %v104_v45 = vadd.s32 %v103_v55, %v94_v33  ;;  %v210_v4 = vsel %vm200_vm12, %v207_v30, %v209_v60  ;;  %v213_v11 = vsel %vm201_vm11, %v195_v54, %v212_v8  ;;  %v183_v17 = vshrl.u32 %v682_v22, %v733_v53 }
  0x28   :  { %vm107_vm14 = vc.u32 %v773_v59, %v768_v52  ;;  %v240_v9 = vand.u32 65535, %v210_v4  ;;  %v241_v10 = vshrl.u32 %v210_v4, 16  ;;  %v214_v12 = vsel %vm200_vm12, %v211_v5, %v213_v11 }
  0x29   :  { %v108_v7 = vadd.s32 1, %v104_v45  ;;  %v218_v15 = vand.u32 65535, %v214_v12  ;;  %v219_v16 = vshrl.u32 %v214_v12, 16  ;;  %v204_v31 = vsel %vm202_vm13, %v192_v47, 2102212464 }
  0x2a   :  { %v243_v58 = vmul.u32 %v241_v10, %v216_v62  ;;  %v242_v18 = vmul.u32 %v240_v9, %v216_v62  ;;  %v244_v20 = vmul.u32 %v240_v9, %v217_v63  ;;  %v245_v19 = vmul.u32 %v241_v10, %v217_v63 }
  0x2b   :  { %v109_v13 = vsel %vm107_vm14, %v108_v7, %v104_v45  ;;  %v220_v25 = vmul.u32 %v218_v15, %v216_v62  ;;  %v221_v27 = vmul.u32 %v219_v16, %v216_v62  ;;  %v222_v29 = vmul.u32 %v218_v15, %v217_v63 }
  0x2c   :  { %v110_v14 = vadd.s32 %v109_v13, %v105_v3  ;;  %v246_v21 = vshll.u32 %v243_v58, 16  ;;  %v248_v32 = vshll.u32 %v244_v20, 16  ;;  %v223_v33 = vmul.u32 %v219_v16, %v217_v63 }
  0x2d   :  { %v224_v26 = vshll.u32 %v221_v27, 16  ;;  %v226_v36 = vshll.u32 %v222_v29, 16  ;;  %v203_v53 = vsel %vm199_vm10, %v183_v17, %v751_v34  ;;  %v205_v40 = vsel %vm201_vm11, %v189_v43, %v204_v31 }
  0x2e   :  { %v111_v23 = vadd.s32 536870912, %v110_v14  ;;  %vm250_vm15 = vc.u32 %v242_v18, %v246_v21  ;;  %v252_v38 = vadd.s32 %v246_v21, %v242_v18  ;;  %v225_v46 = vshrl.u32 %v221_v27, 16 }
  0x2f   :  { %vm228_vm0 = vc.u32 %v220_v25, %v224_v26  ;;  %v230_v39 = vadd.s32 %v224_v26, %v220_v25  ;;  %v251_v42 = vsel %vm250_vm15, 1, %v688_v35  ;;  %v247_v49 = vshrl.u32 %v243_v58, 16 }
  0x30   :  { %v802_v24 = vshrl.u32 %v111_v23, 30  ;;  %v229_v41 = vsel %vm228_vm0, 1, %v688_v35  ;;  %vm254_vm1 = vc.u32 %v252_v38, %v248_v32  ;;  %v253_v50 = vadd.s32 %v251_v42, %v245_v19 }
  0x31   :  { %v231_v47 = vadd.s32 %v229_v41, %v223_v33  ;;  %vm232_vm2 = vc.u32 %v230_v39, %v226_v36  ;;  %v255_v34 = vsel %vm254_vm1, 1, %v688_v35  ;;  %v227_v28 = vshrl.u32 %v222_v29, 16 }
  0x32   :  { %v113_v22 = vshll.u32 %v802_v24, 30  ;;  %v233_v48 = vsel %vm232_vm2, 1, %v688_v35  ;;  %v249_v43 = vshrl.u32 %v244_v20, 16  ;;  %v257_v55 = vadd.s32 %v255_v34, %v253_v50 }
  0x33   :  { %v235_v54 = vadd.s32 %v233_v48, %v231_v47  ;;  %v256_v37 = vadd.s32 %v252_v38, %v248_v32  ;;  %v206_v60 = vsel %vm200_vm12, %v203_v53, %v205_v40  ;;  %v106_v35 = vadd.s32 %v768_v52, %v773_v59 }
  0x34   :  { %v114_v44 = vsub.s32 %v110_v14, %v113_v22  ;;  %v258_v62 = vadd.s32 %v257_v55, %v247_v49  ;;  %v260_v5 = vmul.u32 %v736_v57, %v206_v60  ;;  %v136_v23 = vsub.s32 4, %v802_v24 }
  0x35   :  { %v236_v30 = vadd.s32 %v235_v54, %v225_v46  ;;  %vm14_vm6 = vcmp.lt.s32.totalorder %v702_v0, 0  ;;  %vm826_vm8 = vcmp.le.f32.partialorder %v12_v2, 0.7853982  ;;  %vm169_vm12 = vcmp.lt.s32.totalorder %v707_v1, 0 }
  0x36   :  { %vm115_vm3 = vcmp.lt.s32.totalorder %v114_v44, 0  ;;  %v116_v51 = vsub.s32 0, %v114_v44  ;;  %v259_v4 = vadd.s32 %v258_v62, %v249_v43  ;;  %v137_v33 = vsel %vm14_vm6, %v136_v23, %v802_v24 }
  0x37   :  { %v237_v63 = vadd.s32 %v236_v30, %v227_v28  ;;  %v139_v22 = vsel %vm826_vm8, 0, %v137_v33  ;;  %vm155_vm14 = vweird.f32 %v702_v0  ;;  %vm168_vm15 = vcmp.le.f32.partialorder %v167_v6, 0.7853982 }
  0x38   :  { %v117_v56 = vsel %vm115_vm3, %v116_v51, %v114_v44  ;;  %v263_v7 = vadd.s32 1, %v259_v4  ;;  %v156_v24 = vadd.s32 3, %v139_v22  ;;  %vm310_vm3 = vweird.f32 %v707_v1 }
  0x39   :  { %v118_v45 = vclz %v117_v56  ;;  %vm262_vm4 = vc.u32 %v237_v63, %v256_v37  ;;  %v261_v39 = vadd.s32 %v256_v37, %v237_v63 }
  0x3a   :  { %v264_v13 = vsel %vm262_vm4, %v263_v7, %v259_v4  ;;  %v157_v43 = vand.u32 3, %v156_v24 }
  0x3b   :  { %v664_v3 = vadd.s32 4294967294, %v118_v45  ;;  %v265_v12 = vadd.s32 %v264_v13, %v260_v5 }
  0x3c   :  { %vm162_vm10 = vcmp.eq.s32.totalorder %v157_v43, 2  ;;  %vm159_vm11 = vcmp.eq.s32.totalorder %v157_v43, 0  ;;  %vm158_vm13 = vcmp.lt.s32.totalorder %v157_v43, 2 }
  0x3d   :  { %vm665_vm5 = vcmp.lt.s32.totalorder %v664_v3, 0  ;;  %v266_v14 = vadd.s32 536870912, %v265_v12 }
  0x3e   :  { %v121_v8 = vsel %vm665_vm5, 0, %v664_v3 }
  0x3f   :  { %v122_v9 = vsub.s32 32, %v121_v8  ;;  %v123_v10 = vshll.u32 %v114_v44, %v121_v8  ;;  %v126_v11 = vsub.s32 4294967266, %v121_v8  ;;  %v819_v17 = vshrl.u32 %v266_v14, 30 }
  0x41   :  { %v124_v61 = vshrl.u32 %v106_v35, %v122_v9  ;;  %v127_v58 = vadd.s32 127, %v126_v11  ;;  %v268_v20 = vshll.u32 %v819_v17, 30  ;;  %v291_v8 = vsub.s32 4, %v819_v17 }
  0x43   :  { %v125_v15 = vor.u32 %v124_v61, %v123_v10  ;;  %v128_v16 = vshll.u32 %v127_v58, 23  ;;  %v269_v59 = vsub.s32 %v265_v12, %v268_v20  ;;  %v292_v61 = vsel %vm169_vm12, %v291_v8, %v819_v17 }
  0x45   :  { %v129_v57 = vor.u32 4788187, %v128_v16  ;;  %v132_v18 = vcvt.s32.f32 %v125_v15  ;;  %vm270_vm7 = vcmp.lt.s32.totalorder %v269_v59, 0  ;;  %v271_v25 = vsub.s32 0, %v269_v59 }
  0x46   :  { %v294_v15 = vsel %vm168_vm15, 0, %v292_v61 }
  0x47   :  { %v130_v52 = vand.u32 2147483647, %v129_v57  ;;  %v272_v31 = vsel %vm270_vm7, %v271_v25, %v269_v59  ;;  %v311_v6 = vadd.s32 3, %v294_v15 }
  0x48   :  { %v273_v26 = vclz %v272_v31 }
  0x49   :  { %v133_v21 = vmul.f32 %v132_v18, %v130_v52  ;;  %v312_v23 = vand.u32 3, %v311_v6 }
  0x4a   :  { %v667_v38 = vadd.s32 4294967294, %v273_v26 }
  0x4b   :  { %v134_v29 = vxor.u32 2147483648, %v133_v21  ;;  %vm317_vm0 = vcmp.eq.s32.totalorder %v312_v23, 2  ;;  %vm314_vm1 = vcmp.eq.s32.totalorder %v312_v23, 0  ;;  %vm313_vm2 = vcmp.lt.s32.totalorder %v312_v23, 2 }
  0x4c   :  { %vm668_vm9 = vcmp.lt.s32.totalorder %v667_v38, 0 }
  0x4d   :  { %v135_v32 = vsel %vm14_vm6, %v134_v29, %v133_v21  ;;  %v276_v40 = vsel %vm668_vm9, 0, %v667_v38 }
  0x4e   :  { %v138_v36 = vsel %vm826_vm8, %v702_v0, %v135_v32  ;;  %v277_v44 = vsub.s32 32, %v276_v40  ;;  %v278_v46 = vshll.u32 %v269_v59, %v276_v40  ;;  %v281_v47 = vsub.s32 4294967266, %v276_v40 }
  0x4f   :  { %v140_v19 = vmul.f32 %v138_v36, %v138_v36 }
  0x50   :  { %v279_v50 = vshrl.u32 %v261_v39, %v277_v44  ;;  %v282_v34 = vadd.s32 127, %v281_v47 }
  0x51   :  { %v141_v53 = vmul.f32 -0.001358992, %v140_v19  ;;  %v148_v2 = vmul.f32 -0.00019511016, %v140_v19 }
  0x52   :  { %v280_v54 = vor.u32 %v279_v50, %v278_v46  ;;  %v283_v55 = vshll.u32 %v282_v34, 23 }
  0x53   :  { %v142_v41 = vadd.f32 0.041655596, %v141_v53  ;;  %v149_v42 = vadd.f32 0.008332121, %v148_v2 }
  0x54   :  { %v284_v37 = vor.u32 4788187, %v283_v55  ;;  %v287_v45 = vcvt.s32.f32 %v280_v54 }
  0x55   :  { %v143_v48 = vmul.f32 %v142_v41, %v140_v19  ;;  %v150_v49 = vmul.f32 %v149_v42, %v140_v19 }
  0x56   :  { %v285_v63 = vand.u32 2147483647, %v284_v37 }
  0x57   :  { %v144_v51 = vadd.f32 -0.4999988, %v143_v48  ;;  %v151_v28 = vadd.f32 -0.16666654, %v150_v49 }
  0x58   :  { %v288_v5 = vmul.f32 %v287_v45, %v285_v63 }
  0x59   :  { %v145_v56 = vmul.f32 %v144_v51, %v140_v19  ;;  %v152_v30 = vmul.f32 %v151_v28, %v140_v19 }
  0x5a   :  { %v289_v9 = vxor.u32 2147483648, %v288_v5 }
  0x5b   :  { %v146_v60 = vadd.f32 1.0, %v145_v56  ;;  %v153_v62 = vadd.f32 1.0, %v152_v30 }
  0x5c   :  { %v290_v13 = vsel %vm169_vm12, %v289_v9, %v288_v5 }
  0x5d   :  { %v154_v3 = vmul.f32 %v153_v62, %v138_v36  ;;  %v163_v4 = vxor.u32 2147483648, %v146_v60  ;;  %v293_v58 = vsel %vm168_vm15, %v707_v1, %v290_v13 }
  0x5e   :  { %v295_v14 = vmul.f32 %v293_v58, %v293_v58 }
  0x5f   :  { %v160_v35 = vxor.u32 2147483648, %v154_v3  ;;  %v164_v7 = vsel %vm162_vm10, %v163_v4, %v154_v3 }
  0x60   :  { %v296_v16 = vmul.f32 -0.001358992, %v295_v14  ;;  %v303_v0 = vmul.f32 -0.00019511016, %v295_v14 }
  0x61   :  { %v161_v10 = vsel %vm159_vm11, %v146_v60, %v160_v35 }
  0x62   :  { %v165_v11 = vsel %vm158_vm13, %v161_v10, %v164_v7  ;;  %v297_v57 = vadd.f32 0.041655596, %v296_v16  ;;  %v304_v18 = vadd.f32 0.008332121, %v303_v0 }
  0x63   :  { %v166_v12 = vsel %vm155_vm14, nan, %v165_v11 }
  0x64   :  { %651 = vst [vmem:[%s851_s1] sm:$0xff] %v166_v12  ;;  %v298_v20 = vmul.f32 %v297_v57, %v295_v14  ;;  %v305_v52 = vmul.f32 %v304_v18, %v295_v14 }
  0x66   :  { %v299_v59 = vadd.f32 -0.4999988, %v298_v20  ;;  %v306_v21 = vadd.f32 -0.16666654, %v305_v52 }
  0x68   :  { %v300_v25 = vmul.f32 %v299_v59, %v295_v14  ;;  %v307_v17 = vmul.f32 %v306_v21, %v295_v14 }
  0x6a   :  { %v301_v27 = vadd.f32 1.0, %v300_v25  ;;  %v308_v29 = vadd.f32 1.0, %v307_v17 }
  0x6c   :  { %v309_v31 = vmul.f32 %v308_v29, %v293_v58  ;;  %v318_v32 = vxor.u32 2147483648, %v301_v27 }
  0x6e   :  { %v315_v33 = vxor.u32 2147483648, %v309_v31  ;;  %v319_v26 = vsel %vm317_vm0, %v318_v32, %v309_v31 }
  0x70   :  { %v316_v36 = vsel %vm314_vm1, %v301_v27, %v315_v33 }
  0x71   :  { %v320_v19 = vsel %vm313_vm2, %v316_v36, %v319_v26 }
  0x72   :  { %v321_v38 = vsel %vm310_vm3, nan, %v320_v19 }
  0x73   :  { %653 = vst [vmem:[%s851_s1 + $0x8] sm:$0xff] %v321_v38 }

</bundles_post_ra>
